<compile_context>
chip_gen: v6e
topology: v6e:2x2x1
jax: 0.10.0
libtpu: 0.0.40
codegen_flags: <defaults>
</compile_context>

<pallas_src>
import numpy as np
import jax
import jax.numpy as jnp
from jax.experimental import pallas as pl
from jax.experimental.pallas import tpu as pltpu


# ----------------------------- Pallas kernel ------------------------------- #

def decoder_step_kernel(
    # inputs (all resident in VMEM across the whole grid)
    enc_ref, att1_ref, h0_ref, c0_ref, gemb_ref,
    wcat_ref, b_da_ref, b_fb_ref, w_fa_ref, w_iha_ref,
    # outputs (resident; written row-by-row, flushed once at grid end)
    hseq_ref, alpha_ref,
    # scratch
    h_sc, c_sc,
):
    t = pl.program_id(0)
    B, H = h_sc.shape
    A = b_da_ref.shape[-1]
    Denc = b_fb_ref.shape[-1]

    @pl.when(t == 0)
    def _init():
        h_sc[...] = h0_ref[...]
        c_sc[...] = c0_ref[...]

    h = h_sc[...]                                   # (B, H) f32
    c = c_sc[...]                                   # (B, H) f32
    h_bf = h.astype(jnp.bfloat16)

    # ---- one fused MXU call for every h-dependent projection:
    #      [decoder_att | f_beta | lstm_hh]  -> (B, A + Denc + 4H), f32 accumulation
    hproj = jnp.dot(h_bf, wcat_ref[...], preferred_element_type=jnp.float32)
    att2 = hproj[:, :A] + b_da_ref[...]                                 # (B, A)
    gate = jax.nn.sigmoid(hproj[:, A:A + Denc] + b_fb_ref[...])         # (B, Denc)
    hh_gates = hproj[:, A + Denc:]                                      # (B, 4H)

    # ---- attention scores, vectorized over the full (B, P, A) slab (no per-batch loop).
    # full_att bias is constant over pixels -> cancels exactly in the softmax.
    att = jnp.maximum(att1_ref[...] + att2[:, None, :], 0.0)            # (B, P, A) f32
    score = jnp.sum(att * w_fa_ref[...], axis=-1)                       # (B, P), pixels on lanes

    # ---- per-image softmax over pixels, lane-dense.
    m = jnp.max(score, axis=-1, keepdims=True)                          # (B, 1) exact per-image max
    e = jnp.exp(score - m)
    denom = jnp.sum(e, axis=-1, keepdims=True)
    alpha = e * pl.reciprocal(denom, approx=True)                       # (B, P) f32

    # ---- attention-weighted encoding on the MXU (batched matvec, f32 accumulate).
    awe = jnp.einsum(
        'bqp,bpd->bqd',
        alpha[:, None, :].astype(jnp.bfloat16), enc_ref[...],
        preferred_element_type=jnp.float32)[:, 0, :]                    # (B, Denc)
    awe = gate * awe                                                    # f_beta gating

    # ---- LSTMCell (gate order i, f, g, o).
    # gemb_ref holds emb @ W_ih_e + b_ih + b_hh, precomputed for all T in the wrapper.
    gates = (gemb_ref[t] + hh_gates
             + jnp.dot(awe.astype(jnp.bfloat16), w_iha_ref[...],
                       preferred_element_type=jnp.float32))             # (B, 4H)
    i_g = jax.nn.sigmoid(gates[:, 0 * H:1 * H])
    f_g = jax.nn.sigmoid(gates[:, 1 * H:2 * H])
    g_g = jnp.tanh(gates[:, 2 * H:3 * H])
    o_g = jax.nn.sigmoid(gates[:, 3 * H:4 * H])
    c_new = f_g * c + i_g * g_g
    h_new = o_g * jnp.tanh(c_new)
    h_sc[...] = h_new
    c_sc[...] = c_new

    # Direct writes into the resident, lane-dense output blocks.
    hseq_ref[t] = h_new                                                 # (B, H)
    alpha_ref[t] = alpha                                                # (B, P)


# ----------------------------- parameters ---------------------------------- #

def init_params(key, attention_dim, embed_dim, decoder_dim, vocab_size, encoder_dim):
    ks = list(jax.random.split(key, 16))

    def linear(k, fan_in, fan_out):
        bound = 1.0 / np.sqrt(fan_in)
        kw, kb = jax.random.split(k)
        w = jax.random.uniform(kw, (fan_in, fan_out), jnp.float32, -bound, bound)
        b = jax.random.uniform(kb, (1, fan_out), jnp.float32, -bound, bound)
        return w, b

    p = {}
    p["w_ea"], p["b_ea"] = linear(ks[0], encoder_dim, attention_dim)   # encoder_att
    p["w_da"], p["b_da"] = linear(ks[1], decoder_dim, attention_dim)   # decoder_att
    p["w_fa"], p["b_fa"] = linear(ks[2], attention_dim, 1)             # full_att
    p["w_ih0"], p["b_ih0"] = linear(ks[3], encoder_dim, decoder_dim)   # init_h
    p["w_ic0"], p["b_ic0"] = linear(ks[4], encoder_dim, decoder_dim)   # init_c
    p["w_fb"], p["b_fb"] = linear(ks[5], decoder_dim, encoder_dim)     # f_beta

    # LSTMCell weights: PyTorch stores (4H, in); we store transposed, input block split.
    lstm_in = embed_dim + encoder_dim
    bound = 1.0 / np.sqrt(decoder_dim)
    w_ih = jax.random.uniform(ks[6], (lstm_in, 4 * decoder_dim), jnp.float32, -bound, bound)
    p["w_ih_e"] = w_ih[:embed_dim]                      # acts on the embedding part
    p["w_ih_a"] = w_ih[embed_dim:]                      # acts on the attention part
    p["b_ih"] = jax.random.uniform(ks[7], (1, 4 * decoder_dim), jnp.float32, -bound, bound)
    p["w_hh"] = jax.random.uniform(ks[8], (decoder_dim, 4 * decoder_dim), jnp.float32, -bound, bound)
    p["b_hh"] = jax.random.uniform(ks[9], (1, 4 * decoder_dim), jnp.float32, -bound, bound)

    # fc: weight uniform(-0.1, 0.1), bias zero   (init_weights)
    p["w_fc"] = jax.random.uniform(ks[10], (decoder_dim, vocab_size), jnp.float32, -0.1, 0.1)
    p["b_fc"] = jnp.zeros((1, vocab_size), jnp.float32)

    # embedding table uniform(-0.1, 0.1)        (init_weights)
    p["embedding"] = jax.random.uniform(ks[11], (vocab_size, embed_dim), jnp.float32, -0.1, 0.1)
    return p


# ----------------------------- forward wrapper ------------------------------ #

def decoder_with_attention_forward(params, encoder_out, encoded_captions, caption_lengths):
    """
    encoder_out:      (B, S, S, Denc)  float32
    encoded_captions: (B, Lmax)        int32
    caption_lengths:  (B, 1)           int32
    """
    B = encoder_out.shape[0]
    Denc = encoder_out.shape[3]
    enc3 = encoder_out.reshape(B, -1, Denc)       # (B, P, Denc)
    P = enc3.shape[1]

    # sort by caption length, descending (host-side glue, like torch.sort)
    lengths = caption_lengths[:, 0]
    sort_ind = jnp.argsort(-lengths)
    lengths_sorted = lengths[sort_ind]
    enc3 = enc3[sort_ind]
    caps_sorted = encoded_captions[sort_ind]
    decode_lengths = lengths_sorted - 1
    T = int(np.asarray(decode_lengths).max())     # python loop bound, same as PyTorch

    H = params["w_da"].shape[0]
    A = params["w_da"].shape[1]

    # ---------------- hoisted, time-invariant work (plain XLA) ----------------
    # encoder_att projection (largest matmul) kept f32: it only feeds element-wise math.
    att1 = jnp.einsum('bpd,da->bpa', enc3, params["w_ea"]) + params["b_ea"]   # (B, P, A)
    # init_hidden_state
    mean_enc = enc3.mean(axis=1)                                              # (B, Denc)
    h0 = mean_enc @ params["w_ih0"] + params["b_ih0"]                         # (B, H)
    c0 = mean_enc @ params["w_ic0"] + params["b_ic0"]                         # (B, H)
    # embedding contribution to the LSTM gates + both LSTM biases, for all T at once
    emb = params["embedding"][caps_sorted][:, :T]                             # (B, T, E)
    gemb = emb @ params["w_ih_e"] + params["b_ih"] + params["b_hh"]           # (B, T, 4H)
    gemb = jnp.transpose(gemb, (1, 0, 2))                                     # (T, B, 4H)

    # fused recurrent weight [decoder_att | f_beta | lstm_hh]; bf16 for the MXU.
    w_cat = jnp.concatenate(
        [params["w_da"], params["w_fb"], params["w_hh"]], axis=1).astype(jnp.bfloat16)  # (H, A+Denc+4H)
    w_iha = params["w_ih_a"].astype(jnp.bfloat16)                             # (Denc, 4H)
    enc_bf = enc3.astype(jnp.bfloat16)                                        # (B, P, Denc) MXU operand
    w_fa_row = params["w_fa"].T                                               # (1, A) f32
    # NOTE: params["b_fa"] is omitted on purpose: a scalar added to every pixel score
    # cancels exactly in the per-image softmax.

    def resident(arr):
        nd = arr.ndim
        return pl.BlockSpec(arr.shape, lambda t, _nd=nd: (0,) * _nd)

    in_arrays = (enc_bf, att1, h0, c0, gemb,
                 w_cat, params["b_da"], params["b_fb"], w_fa_row, w_iha)
    in_specs = [resident(a) for a in in_arrays]
    out_specs = [
        pl.BlockSpec((T, B, H), lambda t: (0, 0, 0)),   # hidden states, resident
        pl.BlockSpec((T, B, P), lambda t: (0, 0, 0)),   # alphas, lane-dense (P on lanes), resident
    ]
    scratch_shapes = [
        pltpu.VMEM((B, H), jnp.float32),                # h state (persists across grid)
        pltpu.VMEM((B, H), jnp.float32),                # c state
    ]

    h_seq, alpha_seq = pl.pallas_call(
        decoder_step_kernel,
        out_shape=(jax.ShapeDtypeStruct((T, B, H), jnp.float32),
                   jax.ShapeDtypeStruct((T, B, P), jnp.float32)),
        grid=(T,),
        in_specs=in_specs,
        out_specs=out_specs,
        scratch_shapes=scratch_shapes,
        compiler_params=pltpu.CompilerParams(
            dimension_semantics=("arbitrary",)),        # sequential recurrence over t
    )(*in_arrays)

    # fc head on all (t, b) at once, outside the recurrence.
    # TODO(synk): nn.Dropout(p=0.5) before fc is stochastic in training mode; eval-mode identity used.
    preds = jnp.einsum('tbh,hv->tbv', h_seq, params["w_fc"]) + params["b_fc"]   # (T, B, V)

    # predictions/alphas are only defined for rows still decoding at step t; rest stay zero.
    tmask = (jnp.arange(T)[None, :] < decode_lengths[:, None]).astype(jnp.float32)  # (B, T)
    predictions = jnp.transpose(preds, (1, 0, 2)) * tmask[:, :, None]               # (B, T, V)
    alphas = jnp.transpose(alpha_seq, (1, 0, 2)) * tmask[:, :, None]                # (B, T, P)

    decode_lengths_list = [int(x) for x in np.asarray(decode_lengths)]
    return predictions, caps_sorted, decode_lengths_list, alphas, sort_ind


# ----------------------------------- main ----------------------------------- #

if __name__ == "__main__":
    key = jax.random.PRNGKey(0)
    attention_dim, embed_dim, decoder_dim, vocab_size, encoder_dim = 32, 32, 32, 50, 64
    B, S, Lmax = 4, 4, 8   # batch, enc_image_size, max caption length

    k_enc, k_cap, k_len, k_par = jax.random.split(key, 4)
    encoder_out = jax.random.normal(k_enc, (B, S, S, encoder_dim), jnp.float32)
    encoded_captions = jax.random.randint(k_cap, (B, Lmax), 0, vocab_size, dtype=jnp.int32)
    caption_lengths = jax.random.randint(k_len, (B, 1), 3, Lmax + 1, dtype=jnp.int32)

    params = init_params(k_par, attention_dim, embed_dim, decoder_dim, vocab_size, encoder_dim)

    predictions, caps_sorted, decode_lengths, alphas, sort_ind = decoder_with_attention_forward(
        params, encoder_out, encoded_captions, caption_lengths)

    jax.block_until_ready((predictions, alphas, caps_sorted, sort_ind))
    T = max(decode_lengths)
    assert predictions.shape == (B, T, vocab_size)
    assert alphas.shape == (B, T, S * S)
    assert bool(jnp.all(jnp.isfinite(predictions))) and bool(jnp.all(jnp.isfinite(alphas)))
    # per-image attention weights must sum to 1 on the decoded steps
    row_sums = alphas.sum(-1)
    tmask = (jnp.arange(T)[None, :] < jnp.asarray(decode_lengths)[:, None])
    assert bool(jnp.all(jnp.abs(jnp.where(tmask, row_sums - 1.0, 0.0)) < 1e-2))
    print("KERNEL_OK")
</pallas_src>

<mosaic_0001>
module attributes {stable_mosaic.version = 11 : i64} {
  func.func @decoder_step_kernel(%arg0: i32, %arg1: memref<4x16x64xbf16, #tpu.memory_space<vmem>>, %arg2: memref<4x16x32xf32, #tpu.memory_space<vmem>>, %arg3: memref<4x32xf32, #tpu.memory_space<vmem>>, %arg4: memref<4x32xf32, #tpu.memory_space<vmem>>, %arg5: memref<7x4x128xf32, #tpu.memory_space<vmem>>, %arg6: memref<32x224xbf16, #tpu.memory_space<vmem>>, %arg7: memref<1x32xf32, #tpu.memory_space<vmem>>, %arg8: memref<1x64xf32, #tpu.memory_space<vmem>>, %arg9: memref<1x32xf32, #tpu.memory_space<vmem>>, %arg10: memref<64x128xbf16, #tpu.memory_space<vmem>>, %arg11: memref<7x4x32xf32, #tpu.memory_space<vmem>>, %arg12: memref<7x4x16xf32, #tpu.memory_space<vmem>>, %arg13: memref<4x32xf32, #tpu.memory_space<vmem>>, %arg14: memref<4x32xf32, #tpu.memory_space<vmem>>) attributes {dimension_semantics = [#tpu.dimension_semantics<arbitrary>], iteration_bounds = array<i64: 7>, scalar_prefetch = 0 : i64, scratch_operands = 2 : i64, tpu.core_type = #tpu.core_type<tc>, window_params = [{pipeline_mode = #tpu.pipeline_mode<synchronous>, transform_indices = @transform_0, window_bounds = array<i64: 4, 16, 64>}, {pipeline_mode = #tpu.pipeline_mode<synchronous>, transform_indices = @transform_1, window_bounds = array<i64: 4, 16, 32>}, {pipeline_mode = #tpu.pipeline_mode<synchronous>, transform_indices = @transform_2, window_bounds = array<i64: 4, 32>}, {pipeline_mode = #tpu.pipeline_mode<synchronous>, transform_indices = @transform_3, window_bounds = array<i64: 4, 32>}, {pipeline_mode = #tpu.pipeline_mode<synchronous>, transform_indices = @transform_4, window_bounds = array<i64: 7, 4, 128>}, {pipeline_mode = #tpu.pipeline_mode<synchronous>, transform_indices = @transform_5, window_bounds = array<i64: 32, 224>}, {pipeline_mode = #tpu.pipeline_mode<synchronous>, transform_indices = @transform_6, window_bounds = array<i64: 1, 32>}, {pipeline_mode = #tpu.pipeline_mode<synchronous>, transform_indices = @transform_7, window_bounds = array<i64: 1, 64>}, {pipeline_mode = #tpu.pipeline_mode<synchronous>, transform_indices = @transform_8, window_bounds = array<i64: 1, 32>}, {pipeline_mode = #tpu.pipeline_mode<synchronous>, transform_indices = @transform_9, window_bounds = array<i64: 64, 128>}, {pipeline_mode = #tpu.pipeline_mode<synchronous>, transform_indices = @transform_10, window_bounds = array<i64: 7, 4, 32>}, {pipeline_mode = #tpu.pipeline_mode<synchronous>, transform_indices = @transform_11, window_bounds = array<i64: 7, 4, 16>}]} {
    %c0_i32 = arith.constant 0 : i32
    %0 = arith.cmpi eq, %arg0, %c0_i32 : i32
    %1 = arith.extui %0 : i1 to i32
    %c0_i32_0 = arith.constant 0 : i32
    %2 = arith.cmpi ne, %1, %c0_i32_0 : i32
    scf.if %2 {
      %c0_40 = arith.constant 0 : index
      %c0_41 = arith.constant 0 : index
      %92 = vector.load %arg3[%c0_40, %c0_41] : memref<4x32xf32, #tpu.memory_space<vmem>>, vector<4x32xf32>
      %c0_42 = arith.constant 0 : index
      %c0_43 = arith.constant 0 : index
      %93 = vector.load %arg13[%c0_42, %c0_43] : memref<4x32xf32, #tpu.memory_space<vmem>>, vector<4x32xf32>
      tpu.vector_store %arg13[%c0_42, %c0_43], %92 {strides = array<i32>} : memref<4x32xf32, #tpu.memory_space<vmem>>, vector<4x32xf32>,
      %c0_44 = arith.constant 0 : index
      %c0_45 = arith.constant 0 : index
      %94 = vector.load %arg4[%c0_44, %c0_45] : memref<4x32xf32, #tpu.memory_space<vmem>>, vector<4x32xf32>
      %c0_46 = arith.constant 0 : index
      %c0_47 = arith.constant 0 : index
      %95 = vector.load %arg14[%c0_46, %c0_47] : memref<4x32xf32, #tpu.memory_space<vmem>>, vector<4x32xf32>
      tpu.vector_store %arg14[%c0_46, %c0_47], %94 {strides = array<i32>} : memref<4x32xf32, #tpu.memory_space<vmem>>, vector<4x32xf32>,
    } else {
    }
    %c0 = arith.constant 0 : index
    %c0_1 = arith.constant 0 : index
    %3 = vector.load %arg13[%c0, %c0_1] : memref<4x32xf32, #tpu.memory_space<vmem>>, vector<4x32xf32>
    %c0_2 = arith.constant 0 : index
    %c0_3 = arith.constant 0 : index
    %4 = vector.load %arg14[%c0_2, %c0_3] : memref<4x32xf32, #tpu.memory_space<vmem>>, vector<4x32xf32>
    %5 = arith.truncf %3 : vector<4x32xf32> to vector<4x32xbf16>
    %c0_4 = arith.constant 0 : index
    %c0_5 = arith.constant 0 : index
    %6 = vector.load %arg6[%c0_4, %c0_5] : memref<32x224xbf16, #tpu.memory_space<vmem>>, vector<32x224xbf16>
    %cst = arith.constant dense<0.000000e+00> : vector<4x224xf32>
    %7 = tpu.matmul %5, %6, %cst {dimension_numbers = #tpu.dot_dimension_numbers<[1], [0], [0], [1], [0, 0, 1, 1], [], []>} : vector<4x32xbf16>, vector<32x224xbf16>, vector<4x224xf32> -> vector<4x224xf32>
    %8 = vector.extract_strided_slice %7 {offsets = [0, 0], sizes = [4, 32], strides = [1, 1]} : vector<4x224xf32> to vector<4x32xf32>
    %c0_6 = arith.constant 0 : index
    %c0_7 = arith.constant 0 : index
    %9 = vector.load %arg7[%c0_6, %c0_7] : memref<1x32xf32, #tpu.memory_space<vmem>>, vector<1x32xf32>
    %10 = vector.broadcast %9 : vector<1x32xf32> to vector<4x32xf32>
    %11 = arith.addf %8, %10 : vector<4x32xf32>
    %12 = vector.extract_strided_slice %7 {offsets = [0, 32], sizes = [4, 64], strides = [1, 1]} : vector<4x224xf32> to vector<4x64xf32>
    %c0_8 = arith.constant 0 : index
    %c0_9 = arith.constant 0 : index
    %13 = vector.load %arg8[%c0_8, %c0_9] : memref<1x64xf32, #tpu.memory_space<vmem>>, vector<1x64xf32>
    %14 = vector.broadcast %13 : vector<1x64xf32> to vector<4x64xf32>
    %15 = arith.addf %12, %14 : vector<4x64xf32>
    %16 = arith.negf %15 : vector<4x64xf32>
    %17 = math.exp %16 : vector<4x64xf32>
    %cst_10 = arith.constant 1.000000e+00 : f32
    %18 = vector.broadcast %cst_10 : f32 to vector<4x64xf32>
    %19 = arith.addf %18, %17 : vector<4x64xf32>
    %20 = arith.divf %18, %19 : vector<4x64xf32>
    %21 = vector.extract_strided_slice %7 {offsets = [0, 96], sizes = [4, 128], strides = [1, 1]} : vector<4x224xf32> to vector<4x128xf32>
    %c0_11 = arith.constant 0 : index
    %c0_12 = arith.constant 0 : index
    %c0_13 = arith.constant 0 : index
    %22 = vector.load %arg2[%c0_11, %c0_12, %c0_13] : memref<4x16x32xf32, #tpu.memory_space<vmem>>, vector<4x16x32xf32>
    %23 = vector.shape_cast %11 : vector<4x32xf32> to vector<4x1x32xf32>
    %24 = vector.broadcast %23 : vector<4x1x32xf32> to vector<4x16x32xf32>
    %25 = arith.addf %22, %24 : vector<4x16x32xf32>
    %cst_14 = arith.constant 0.000000e+00 : f32
    %26 = vector.broadcast %cst_14 : f32 to vector<4x16x32xf32>
    %27 = arith.maximumf %25, %26 : vector<4x16x32xf32>
    %c0_15 = arith.constant 0 : index
    %c0_16 = arith.constant 0 : index
    %28 = vector.load %arg9[%c0_15, %c0_16] : memref<1x32xf32, #tpu.memory_space<vmem>>, vector<1x32xf32>
    %29 = vector.shape_cast %28 : vector<1x32xf32> to vector<1x1x32xf32>
    %30 = vector.broadcast %29 : vector<1x1x32xf32> to vector<4x16x32xf32>
    %31 = arith.mulf %27, %30 : vector<4x16x32xf32>
    %cst_17 = arith.constant dense<0.000000e+00> : vector<4x16xf32>
    %32 = vector.multi_reduction <add>, %31, %cst_17 [2] : vector<4x16x32xf32> to vector<4x16xf32>
    %cst_18 = arith.constant dense<0xFF800000> : vector<4xf32>
    %33 = vector.multi_reduction <maximumf>, %32, %cst_18 [1] : vector<4x16xf32> to vector<4xf32>
    %34 = vector.shape_cast %33 : vector<4xf32> to vector<4x1xf32>
    %35 = vector.broadcast %34 : vector<4x1xf32> to vector<4x16xf32>
    %36 = arith.subf %32, %35 : vector<4x16xf32>
    %37 = math.exp %36 : vector<4x16xf32>
    %cst_19 = arith.constant dense<0.000000e+00> : vector<4xf32>
    %38 = vector.multi_reduction <add>, %37, %cst_19 [1] : vector<4x16xf32> to vector<4xf32>
    %39 = vector.shape_cast %38 : vector<4xf32> to vector<4x1xf32>
    %40 = tpu.reciprocal %39 {approx = true} : vector<4x1xf32> -> vector<4x1xf32>
    %41 = vector.broadcast %40 : vector<4x1xf32> to vector<4x16xf32>
    %42 = arith.mulf %37, %41 : vector<4x16xf32>
    %43 = vector.shape_cast %42 : vector<4x16xf32> to vector<4x1x16xf32>
    %44 = arith.truncf %43 : vector<4x1x16xf32> to vector<4x1x16xbf16>
    %c0_20 = arith.constant 0 : index
    %c0_21 = arith.constant 0 : index
    %c0_22 = arith.constant 0 : index
    %45 = vector.load %arg1[%c0_20, %c0_21, %c0_22] : memref<4x16x64xbf16, #tpu.memory_space<vmem>>, vector<4x16x64xbf16>
    "tpu.trace_start"() <{level = 10 : i32, message = "bqp,bpd->bqd"}> : () -> ()
    %cst_23 = arith.constant dense<0.000000e+00> : vector<4x1x64xf32>
    %46 = tpu.matmul %44, %45, %cst_23 {dimension_numbers = #tpu.dot_dimension_numbers<[2], [1], [1], [2], [0, 0, 0, 1, 1, 2], [0], [0]>} : vector<4x1x16xbf16>, vector<4x16x64xbf16>, vector<4x1x64xf32> -> vector<4x1x64xf32>
    "tpu.trace_stop"() : () -> ()
    %47 = vector.shape_cast %46 : vector<4x1x64xf32> to vector<4x64xf32>
    %48 = arith.mulf %20, %47 : vector<4x64xf32>
    %49 = arith.index_cast %arg0 : i32 to index
    %c0_24 = arith.constant 0 : index
    %c0_25 = arith.constant 0 : index
    %50 = vector.load %arg5[%49, %c0_24, %c0_25] : memref<7x4x128xf32, #tpu.memory_space<vmem>>, vector<1x4x128xf32>
    %51 = vector.shape_cast %50 : vector<1x4x128xf32> to vector<4x128xf32>
    %52 = arith.addf %51, %21 : vector<4x128xf32>
    %53 = arith.truncf %48 : vector<4x64xf32> to vector<4x64xbf16>
    %c0_26 = arith.constant 0 : index
    %c0_27 = arith.constant 0 : index
    %54 = vector.load %arg10[%c0_26, %c0_27] : memref<64x128xbf16, #tpu.memory_space<vmem>>, vector<64x128xbf16>
    %cst_28 = arith.constant dense<0.000000e+00> : vector<4x128xf32>
    %55 = tpu.matmul %53, %54, %cst_28 {dimension_numbers = #tpu.dot_dimension_numbers<[1], [0], [0], [1], [0, 0, 1, 1], [], []>} : vector<4x64xbf16>, vector<64x128xbf16>, vector<4x128xf32> -> vector<4x128xf32>
    %56 = arith.addf %52, %55 : vector<4x128xf32>
    %57 = vector.extract_strided_slice %56 {offsets = [0, 0], sizes = [4, 32], strides = [1, 1]} : vector<4x128xf32> to vector<4x32xf32>
    %58 = arith.negf %57 : vector<4x32xf32>
    %59 = math.exp %58 : vector<4x32xf32>
    %cst_29 = arith.constant 1.000000e+00 : f32
    %60 = vector.broadcast %cst_29 : f32 to vector<4x32xf32>
    %61 = arith.addf %60, %59 : vector<4x32xf32>
    %62 = arith.divf %60, %61 : vector<4x32xf32>
    %63 = vector.extract_strided_slice %56 {offsets = [0, 32], sizes = [4, 32], strides = [1, 1]} : vector<4x128xf32> to vector<4x32xf32>
    %64 = arith.negf %63 : vector<4x32xf32>
    %65 = math.exp %64 : vector<4x32xf32>
    %cst_30 = arith.constant 1.000000e+00 : f32
    %66 = vector.broadcast %cst_30 : f32 to vector<4x32xf32>
    %67 = arith.addf %66, %65 : vector<4x32xf32>
    %68 = arith.divf %66, %67 : vector<4x32xf32>
    %69 = vector.extract_strided_slice %56 {offsets = [0, 64], sizes = [4, 32], strides = [1, 1]} : vector<4x128xf32> to vector<4x32xf32>
    %70 = math.tanh %69 : vector<4x32xf32>
    %71 = vector.extract_strided_slice %56 {offsets = [0, 96], sizes = [4, 32], strides = [1, 1]} : vector<4x128xf32> to vector<4x32xf32>
    %72 = arith.negf %71 : vector<4x32xf32>
    %73 = math.exp %72 : vector<4x32xf32>
    %cst_31 = arith.constant 1.000000e+00 : f32
    %74 = vector.broadcast %cst_31 : f32 to vector<4x32xf32>
    %75 = arith.addf %74, %73 : vector<4x32xf32>
    %76 = arith.divf %74, %75 : vector<4x32xf32>
    %77 = arith.mulf %68, %4 : vector<4x32xf32>
    %78 = arith.mulf %62, %70 : vector<4x32xf32>
    %79 = arith.addf %77, %78 : vector<4x32xf32>
    %80 = math.tanh %79 : vector<4x32xf32>
    %81 = arith.mulf %76, %80 : vector<4x32xf32>
    %c0_32 = arith.constant 0 : index
    %c0_33 = arith.constant 0 : index
    %82 = vector.load %arg13[%c0_32, %c0_33] : memref<4x32xf32, #tpu.memory_space<vmem>>, vector<4x32xf32>
    tpu.vector_store %arg13[%c0_32, %c0_33], %81 {strides = array<i32>} : memref<4x32xf32, #tpu.memory_space<vmem>>, vector<4x32xf32>,
    %c0_34 = arith.constant 0 : index
    %c0_35 = arith.constant 0 : index
    %83 = vector.load %arg14[%c0_34, %c0_35] : memref<4x32xf32, #tpu.memory_space<vmem>>, vector<4x32xf32>
    tpu.vector_store %arg14[%c0_34, %c0_35], %79 {strides = array<i32>} : memref<4x32xf32, #tpu.memory_space<vmem>>, vector<4x32xf32>,
    %84 = arith.index_cast %arg0 : i32 to index
    %c0_36 = arith.constant 0 : index
    %c0_37 = arith.constant 0 : index
    %85 = vector.load %arg11[%84, %c0_36, %c0_37] : memref<7x4x32xf32, #tpu.memory_space<vmem>>, vector<1x4x32xf32>
    %86 = vector.shape_cast %85 : vector<1x4x32xf32> to vector<4x32xf32>
    %87 = vector.shape_cast %81 : vector<4x32xf32> to vector<1x4x32xf32>
    tpu.vector_store %arg11[%84, %c0_36, %c0_37], %87 {strides = array<i32>} : memref<7x4x32xf32, #tpu.memory_space<vmem>>, vector<1x4x32xf32>,
    %88 = arith.index_cast %arg0 : i32 to index
    %c0_38 = arith.constant 0 : index
    %c0_39 = arith.constant 0 : index
    %89 = vector.load %arg12[%88, %c0_38, %c0_39] : memref<7x4x16xf32, #tpu.memory_space<vmem>>, vector<1x4x16xf32>
    %90 = vector.shape_cast %89 : vector<1x4x16xf32> to vector<4x16xf32>
    %91 = vector.shape_cast %42 : vector<4x16xf32> to vector<1x4x16xf32>
    tpu.vector_store %arg12[%88, %c0_38, %c0_39], %91 {strides = array<i32>} : memref<7x4x16xf32, #tpu.memory_space<vmem>>, vector<1x4x16xf32>,
    return
  }
  func.func @transform_0(%arg0: i32) -> (i32, i32, i32) {
    %c0_i32 = arith.constant 0 : i32
    %c0_i32_0 = arith.constant 0 : i32
    %c0_i32_1 = arith.constant 0 : i32
    %c0_i32_2 = arith.constant 0 : i32
    return %c0_i32, %c0_i32_0, %c0_i32_1 : i32, i32, i32
  }
  func.func @transform_1(%arg0: i32) -> (i32, i32, i32) {
    %c0_i32 = arith.constant 0 : i32
    %c0_i32_0 = arith.constant 0 : i32
    %c0_i32_1 = arith.constant 0 : i32
    %c0_i32_2 = arith.constant 0 : i32
    return %c0_i32, %c0_i32_0, %c0_i32_1 : i32, i32, i32
  }
  func.func @transform_2(%arg0: i32) -> (i32, i32) {
    %c0_i32 = arith.constant 0 : i32
    %c0_i32_0 = arith.constant 0 : i32
    %c0_i32_1 = arith.constant 0 : i32
    return %c0_i32, %c0_i32_0 : i32, i32
  }
  func.func @transform_3(%arg0: i32) -> (i32, i32) {
    %c0_i32 = arith.constant 0 : i32
    %c0_i32_0 = arith.constant 0 : i32
    %c0_i32_1 = arith.constant 0 : i32
    return %c0_i32, %c0_i32_0 : i32, i32
  }
  func.func @transform_4(%arg0: i32) -> (i32, i32, i32) {
    %c0_i32 = arith.constant 0 : i32
    %c0_i32_0 = arith.constant 0 : i32
    %c0_i32_1 = arith.constant 0 : i32
    %c0_i32_2 = arith.constant 0 : i32
    return %c0_i32, %c0_i32_0, %c0_i32_1 : i32, i32, i32
  }
  func.func @transform_5(%arg0: i32) -> (i32, i32) {
    %c0_i32 = arith.constant 0 : i32
    %c0_i32_0 = arith.constant 0 : i32
    %c0_i32_1 = arith.constant 0 : i32
    return %c0_i32, %c0_i32_0 : i32, i32
  }
  func.func @transform_6(%arg0: i32) -> (i32, i32) {
    %c0_i32 = arith.constant 0 : i32
    %c0_i32_0 = arith.constant 0 : i32
    %c0_i32_1 = arith.constant 0 : i32
    return %c0_i32, %c0_i32_0 : i32, i32
  }
  func.func @transform_7(%arg0: i32) -> (i32, i32) {
    %c0_i32 = arith.constant 0 : i32
    %c0_i32_0 = arith.constant 0 : i32
    %c0_i32_1 = arith.constant 0 : i32
    return %c0_i32, %c0_i32_0 : i32, i32
  }
  func.func @transform_8(%arg0: i32) -> (i32, i32) {
    %c0_i32 = arith.constant 0 : i32
    %c0_i32_0 = arith.constant 0 : i32
    %c0_i32_1 = arith.constant 0 : i32
    return %c0_i32, %c0_i32_0 : i32, i32
  }
  func.func @transform_9(%arg0: i32) -> (i32, i32) {
    %c0_i32 = arith.constant 0 : i32
    %c0_i32_0 = arith.constant 0 : i32
    %c0_i32_1 = arith.constant 0 : i32
    return %c0_i32, %c0_i32_0 : i32, i32
  }
  func.func @transform_10(%arg0: i32) -> (i32, i32, i32) {
    %c0_i32 = arith.constant 0 : i32
    %c0_i32_0 = arith.constant 0 : i32
    %c0_i32_1 = arith.constant 0 : i32
    %c0_i32_2 = arith.constant 0 : i32
    return %c0_i32, %c0_i32_0, %c0_i32_1 : i32, i32, i32
  }
  func.func @transform_11(%arg0: i32) -> (i32, i32, i32) {
    %c0_i32 = arith.constant 0 : i32
    %c0_i32_0 = arith.constant 0 : i32
    %c0_i32_1 = arith.constant 0 : i32
    %c0_i32_2 = arith.constant 0 : i32
    return %c0_i32, %c0_i32_0, %c0_i32_1 : i32, i32, i32
  }
}

</mosaic_0001>

<bundles_post_ra>
// kernel: tpu_custom_call.1
= control target key start
LH: loop header
LB: loop body
LE: loop exit
PB: predicated region body
PF: predicated region fallthrough
CT: control target
= control target key end

     0   :  { %17 = vsyncpa [#allocation5], 0  ;;  %s2407_s0 = inlined_call_operand.hbm [shape: bf16[4,16,64], index: 0, kind: input, shape index: {}]   ;;  %s2408_s1 = inlined_call_operand.hbm [shape: f32[4,16,32], index: 1, kind: input, shape index: {}]   ;;  %s2409_s2 = inlined_call_operand.hbm [shape: f32[4,32], index: 2, kind: input, shape index: {}]   ;;  %s2410_s3 = inlined_call_operand.vmem [shape: f32[4,32], index: 3, kind: input, shape index: {}]   ;;  %s2411_s4 = inlined_call_operand.hbm [shape: f32[7,4,128], index: 4, kind: input, shape index: {}]   ;;  %s2412_s5 = inlined_call_operand.hbm [shape: bf16[32,224], index: 5, kind: input, shape index: {}]   ;;  %s2413_s6 = inlined_call_operand.vmem [shape: f32[1,32], index: 6, kind: input, shape index: {}]   ;;  %s2414_s7 = inlined_call_operand.vmem [shape: f32[1,64], index: 7, kind: input, shape index: {}]   ;;  %s2415_s8 = inlined_call_operand.vmem [shape: f32[1,32], index: 8, kind: input, shape index: {}]   ;;  %s2416_s9 = inlined_call_operand.hbm [shape: bf16[64,128], index: 9, kind: input, shape index: {}]   ;;  %s2417_s10 = inlined_call_operand.hbm [shape: f32[7,4,32], index: 10, kind: output, shape index: {0}]   ;;  %s2418_s11 = inlined_call_operand.hbm [shape: f32[7,4,16], index: 11, kind: output, shape index: {1}]  }
   0x1   :  { %18 = vsyncpa [#allocation8], 0 }
   0x2   :  { %19 = vsyncpa [#allocation11], 0 }
   0x3   :  { %20 = vsyncpa [#allocation14], 0 }
   0x4   :  { %21 = vsyncpa [#allocation6], 0 }
   0x5   :  { %22 = vsyncpa [#allocation17], 0  ;;  %s2046_s17 = smov 0  }
   0x6 LB: > { %s1966_s18 = smov [#allocation7]   ;;  %s2052_s20 = sadd.s32 4294967295, %s1964_s17   ;;  %s1964_s17 = sphi %s2046_s17, %s28_s17  }
   0x7   : > { %s310_s19 = sshll.u32 %s1966_s18, 4  ;;  %p1495_p0 = scmp.ge.s32.totalorder %s1964_s17, 1  ;;  %s311_s19 = int_to_ptr.vmem [resolvable:$true] %s310_s19 }
   0x8   : > { %p285_p1 = scmp.lt.s32.totalorder %s1964_s17, 8  ;;  %p2419_p3 = scmp.eq.s32.totalorder %s2052_s20, 0 }
   0x9   : > { %s1967_s23 = smov [#allocation10]   ;;  %s1968_s25 = smov [#allocation4]  }
   0xa   : > { %p2058_p4 = pnand %p1495_p0, %p285_p1  ;;  %s337_s24 = sshll.u32 %s1967_s23, 4  ;;  %s2070_s24 = int_to_ptr.vmem [resolvable:$true] %s337_s24 }
   0xb   : > { %s297_s26 = sshll.u32 %s1968_s25, 4  ;;  %s1741_s28 = scalar_lea.vmem %s311_s19, 1024  ;;  %s2072_s26 = int_to_ptr.vmem [resolvable:$true] %s297_s26 }
   0xc   : > { %s2421_s21 = scalar_select %p2058_p4, 1, 0 }
   0xd   : > { %p1621_p5 = pneg %p2058_p4  ;;  %p1742_p8 = scmp.ne.s32.totalorder %s311_s19, %s1741_s28 }
   0xe   : > { %p1749_p11 = scmp.lt.s32.totalorder %s311_s19, %s311_s19  ;;  %p1750_p12 = scmp.lt.s32.totalorder %s1741_s28, %s1741_s28 }
   0xf   : > { %p2066_p6 = pnand %p2419_p3, %p1621_p5 }
  0x10   : > { %p1751_p13 = por %p1750_p12, %p1749_p11 }
  0x11   : > { %p2076_p7 = pneg %p2066_p6 }
  0x13   : > { %p1744_p9 = pnand %p1742_p8, %p2076_p7 }
  0x15   : > { %p1745_p10 = pneg %p1744_p9 }
  0x17   : > { %p1752_p0 = pnand %p1751_p13, %p1745_p10 }
  0x19   : > { %1755 = shalt.err (!%p1752_p0)
}
  0x1a   : > { %s1969_s29 = smov 128   ;;  %s1970_s30 = smov 8  }
  0x1b   : > { %1627 = dma.hbm_to_vmem [thread:$0]  (!%p2066_p6), %s2408_s1, 1024, %s311_s19, [#allocation8], %s1969_s29, %s1969_s29, %s1970_s30  }
  0x1c   : > { %s1767_s14 = scalar_lea.vmem %s2070_s24, 448  ;;  %p1775_p9 = scmp.lt.s32.totalorder %s2070_s24, %s2070_s24 }
  0x1d   : > { %p1768_p1 = scmp.ne.s32.totalorder %s2070_s24, %s1767_s14  ;;  %p1776_p10 = scmp.lt.s32.totalorder %s1767_s14, %s1767_s14 }
  0x1f   : > { %p1770_p5 = pnand %p1768_p1, %p2076_p7  ;;  %p1777_p11 = por %p1776_p10, %p1775_p9 }
  0x21   : > { %p1771_p8 = pneg %p1770_p5 }
  0x23   : > { %p1778_p12 = pnand %p1777_p11, %p1771_p8 }
  0x25   : > { %1781 = shalt.err (!%p1778_p12)
}
  0x26   : > { %s1971_s15 = smov 64   ;;  %s1972_s16 = smov 4  }
  0x27   : > { %1633 = dma.hbm_to_vmem [thread:$0]  (!%p2066_p6), %s2411_s4, 448, %s2070_s24, [#allocation11], %s1971_s15, %s1971_s15, %s1972_s16  }
  0x28   : > { %s1793_s23 = scalar_lea.vmem %s2072_s26, 512  ;;  %p1801_p5 = scmp.lt.s32.totalorder %s2072_s26, %s2072_s26 }
  0x29   : > { %p1794_p13 = scmp.ne.s32.totalorder %s2072_s26, %s1793_s23  ;;  %p1802_p8 = scmp.lt.s32.totalorder %s1793_s23, %s1793_s23 }
  0x2b   : > { %p1796_p0 = pnand %p1794_p13, %p2076_p7  ;;  %p1803_p9 = por %p1802_p8, %p1801_p5 }
  0x2d   : > { %p1797_p1 = pneg %p1796_p0 }
  0x2f   : > { %p1804_p10 = pnand %p1803_p9, %p1797_p1 }
  0x31   : > { %1807 = shalt.err (!%p1804_p10)
}
  0x32   : > { %1624 = dma.hbm_to_vmem [thread:$0]  (!%p2066_p6), %s2407_s0, 512, %s2072_s26, [#allocation5], %s1971_s15, %s1971_s15, %s1972_s16  }
  0x33   : > { %s1973_s24 = smov [#allocation9]   ;;  %s1974_s13 = smov [#allocation12]  }
  0x34   : > { %s324_s12 = sshll.u32 %s1973_s24, 4  ;;  %s350_s14 = sshll.u32 %s1974_s13, 4  ;;  %s325_s12 = int_to_ptr.vmem [resolvable:$true] %s324_s12  ;;  %s351_s14 = int_to_ptr.vmem [resolvable:$true] %s350_s14 }
  0x35   : > { %s1819_s18 = scalar_lea.vmem %s325_s12, 64  ;;  %p1827_p0 = scmp.lt.s32.totalorder %s325_s12, %s325_s12 }
  0x36   : > { %p1820_p11 = scmp.ne.s32.totalorder %s325_s12, %s1819_s18  ;;  %p1828_p1 = scmp.lt.s32.totalorder %s1819_s18, %s1819_s18 }
  0x38   : > { %p1822_p12 = pnand %p1820_p11, %p2076_p7  ;;  %p1829_p5 = por %p1828_p1, %p1827_p0 }
  0x3a   : > { %p1823_p13 = pneg %p1822_p12 }
  0x3c   : > { %p1830_p8 = pnand %p1829_p5, %p1823_p13 }
  0x3e   : > { %1833 = shalt.err (!%p1830_p8)
}
  0x3f   : > { %1630 = dma.hbm_to_vmem [thread:$0]  (!%p2066_p6), %s2409_s2, 64, %s325_s12, [#allocation8]  }
  0x40   : > { %s1845_s23 = scalar_lea.vmem %s351_s14, 512  ;;  %p1853_p3 = scmp.lt.s32.totalorder %s351_s14, %s351_s14 }
  0x41   : > { %p1846_p9 = scmp.ne.s32.totalorder %s351_s14, %s1845_s23  ;;  %p1854_p11 = scmp.lt.s32.totalorder %s1845_s23, %s1845_s23 }
  0x43   : > { %p1848_p10 = pnand %p1846_p9, %p2076_p7  ;;  %p1855_p12 = por %p1854_p11, %p1853_p3 }
  0x45   : > { %p1849_p2 = pneg %p1848_p10 }
  0x47   : > { %p1856_p4 = pnand %p1855_p12, %p1849_p2 }
  0x49   : > { %1859 = shalt.err (!%p1856_p4)
}
  0x4a   : > { %1636 = dma.hbm_to_vmem [thread:$0]  (!%p2066_p6), %s2412_s5, 512, %s351_s14, [#allocation11], %s1969_s29, %s1969_s29, %s1970_s30  }
  0x4b   : > { %s1975_s24 = smov [#allocation13]  }
  0x4c   : > { %s372_s12 = sshll.u32 %s1975_s24, 4  ;;  %s373_s12 = int_to_ptr.vmem [resolvable:$true] %s372_s12 }
  0x4d   : > { %s1871_s13 = scalar_lea.vmem %s373_s12, 512  ;;  %p1879_p2 = scmp.lt.s32.totalorder %s373_s12, %s373_s12 }
  0x4e   : > { %p1872_p13 = scmp.ne.s32.totalorder %s373_s12, %s1871_s13  ;;  %p1880_p4 = scmp.lt.s32.totalorder %s1871_s13, %s1871_s13 }
  0x50   : > { %p1874_p0 = pnand %p1872_p13, %p2076_p7  ;;  %p1881_p1 = por %p1880_p4, %p1879_p2 }
  0x52   : > { %p1875_p3 = pneg %p1874_p0 }
  0x54   : > { %p1882_p5 = pnand %p1881_p1, %p1875_p3 }
  0x56   : > { %1885 = shalt.err (!%p1882_p5)
}
  0x57   : > { %1639 = dma.hbm_to_vmem [thread:$0]  (!%p2066_p6), %s2416_s9, 512, %s373_s12, [#allocation14], %s1971_s15, %s1971_s15, %s1972_s16  }
  0x58   : > { %p2424_p8 = scmp.ne.s32.totalorder %s2421_s21, 0 }
  0x59   : > { %p2425_p7 = scmp.eq.s32.totalorder (!%p2424_p8), %s2052_s20, 0 }
  0x5a   : > { %388 = sbr.rel (%p2424_p8) target bundleno = 2244 (0x8c4), region = 60 }
  0x5f   : > { %1939 = dma.done.wait (%p2425_p7), [#allocation5], 512   ;;  %p2426_p9 = pmov %p2425_p7 }
  0x60   : > { %p2427_p10 = pmov %p2425_p7 }
  0x61   : > { %1941 = vsyncadd (%p2426_p9), [#allocation5], 4294966784 }
  0x62   : > { %1943 = dma.done.wait (%p2427_p10), [#allocation8], 1088   ;;  %p2428_p11 = pmov %p2425_p7 }
  0x63   : > { %p2429_p12 = pmov %p2425_p7 }
  0x64   : > { %1945 = vsyncadd (%p2428_p11), [#allocation8], 4294966208 }
  0x65   : > { %1947 = dma.done.wait (%p2429_p12), [#allocation11], 960   ;;  %p2430_p6 = pmov %p2425_p7 }
  0x67   : > { %1949 = vsyncadd (%p2430_p6), [#allocation11], 4294966336  ;;  %p2431_p13 = pmov %p2430_p6 }
  0x68   : > { %p2432_p0 = pmov %p2430_p6 }
  0x69   : > { %1951 = dma.done.wait (%p2431_p13), [#allocation14], 512  }
  0x6a   : > { %1953 = vsyncadd (%p2432_p0), [#allocation14], 4294966784  ;;  %p2433_p3 = scmp.ne.s32.totalorder %s2052_s20, 0 }
  0x6c   : > { %442 = sbr.rel (%p2433_p3) target bundleno = 115 (0x73), region = 88 }
  0x71   : > { %v443_v0 = vld [vmem:[#allocation9] sm:$0xf]  ;;  %vm444_vm0 = vcmask 257024   ;;  %v446_v1 = vld [vmem:[%s2410_s3] sm:$0xf] }
  0x72   : > { %445 = vst.msk [vmem:[#allocation2] sm:$0xf] %vm444_vm0, %v443_v0  ;;  %447 = vst.msk [vmem:[#allocation3] sm:$0xf] %vm444_vm0, %v446_v1 }
  0x73 PF: > { %v1686_v2 = vld [vmem:[#allocation12 + $0x14] ss:$8 sps:$4 sm:$0xff]   ;;  %v1688_v3 = vld [vmem:[#allocation12 + $0x10] ss:$8 sps:$4 sm:$0xff]   ;;  %v1976_v4 = vmov 0   ;;  %vm475_vm1 = vcmask 261120   ;;  %v556_v11 = vlaneseq }
  0x74   : > { %511 = vmatprep.mubr.bf16.mxu0 %v1976_v4  ;;  %1685 = vset.pattern.permute.xlu0 %v1976_v4  ;;  %v1689_v5 = vld [vmem:[#allocation12 + $0x4] ss:$8 sps:$4 sm:$0xff]   ;;  %v1691_v6 = vld [vmem:[#allocation12] ss:$8 sps:$4 sm:$0xff]   ;;  %v1977_v9 = vmov 1966171168  }
  0x75   : > { %491 = vmatprep.subr.bf16.mxu0 %v1686_v2  ;;  %1684 = vset.pattern.permute.xlu1 %v1976_v4  ;;  %v554_v10 = vunpack.c.l.s4 %v1977_v9  ;;  %v2172_v13 = vshrl.u32 %v556_v11, 7  ;;  %v1515_v14 = vld [vmem:[%s2413_s6] ss:$0 sm:$0xff]  ;;  %v544_v25 = vld [vmem:[#allocation7] sm:$0xff]  ;;  %v545_v26 = vld [vmem:[#allocation7 + $0x8] sm:$0xff]  ;;  %vm671_vm2 = vcmask 130112  }
  0x76   : > { %492 = vmatpush1.bf16.msra.mxu0 %v1688_v3  ;;  %v546_v30 = vld [vmem:[#allocation7 + $0x10] sm:$0xff]  ;;  %v547_v31 = vld [vmem:[#allocation7 + $0x18] sm:$0xff]  ;;  %v548_v35 = vld [vmem:[#allocation7 + $0x20] sm:$0xff]  ;;  %vm700_vm3 = vcmask 1041409   ;;  %vm702_vm4 = vcmask 1042434   ;;  %vm704_vm5 = vcmask 1043459  }
  0x77   : > { %493 = vmatprep.subr.bf16.mxu0 %v1689_v5  ;;  %v555_v12 = vunpack.c.0.s8 %v554_v10  ;;  %v2184_v20 = vsub.s32 0, %v2172_v13  ;;  %v1518_v37 = vld [vmem:[%s2415_s8] ss:$0 sm:$0xff]  ;;  %v549_v38 = vld [vmem:[#allocation7 + $0x28] sm:$0xff]  ;;  %v550_v45 = vld [vmem:[#allocation7 + $0x30] sm:$0xff]  ;;  %v661_v10 = vand.u32 127, %v556_v11 }
  0x78   : > { %v551_v52 = vld [vmem:[#allocation7 + $0x38] sm:$0xff]  ;;  %vm707_vm6 = vcmask 125952   ;;  %s1978_s26 = smov 32   ;;  %vm1980_vm7 = vmmov 0   ;;  %vm898_vm8 = vcmask 130048   ;;  %s1981_s23 = smov 96  }
  0x79   : > { %v448_v7 = vld [vmem:[#allocation2] sm:$0xf]  ;;  %v558_v15 = vsub.s32 %v555_v12, %v2172_v13  ;;  %vm1208_vm9 = vcmask 523264   ;;  %s2339_s25 = sshll.u32 %s2052_s20, 2  ;;  %s1982_s24 = smov 64   ;;  %vm1285_vm10 = vcmask 257024  }
  0x7a   : > { %v450_v8 = vpack.c.bf16 %v448_v7, %v448_v7  ;;  %494 = vmatpush1.bf16.msra.mxu0 %v1691_v6  ;;  %s1161_s28 = scalar_lea.vmem [#allocation10], %s2339_s25  ;;  %s1983_s12 = smov [#allocation16]  }
  0x7b   : > { %s1387_s13 = sshll.u32 %s1983_s12, 4  ;;  %p1652_p2 = scmp.eq.s32.totalorder %s2052_s20, 6  ;;  %s1388_s13 = int_to_ptr.vmem [resolvable:$true] %s1387_s13 }
  0x7c   : > { %s1366_s18 = scalar_lea.vmem [#allocation16], %s2339_s25  ;;  %s1886_s29 = scalar_lea.vmem %s1388_s13, 448 }
  0x7d   : > { %1514 = vmatmul.mubr.msk.bf16.vlgmr.msra.gmra.mxu0 %vm475_vm1, %v450_v8  ;;  %p1887_p4 = scmp.ne.s32.totalorder %s1388_s13, %s1886_s29  ;;  %p1893_p8 = scmp.lt.s32.totalorder %s1388_s13, %s1388_s13 }
  0x7e   : > { %p1894_p7 = scmp.lt.s32.totalorder %s1886_s29, %s1886_s29 }
  0x7f   : > { %p1888_p1 = pnand %p1887_p4, %p1652_p2 }
  0x80   : > { %p1895_p9 = por %p1894_p7, %p1893_p8 }
  0x81   : > { %p1889_p5 = pneg %p1888_p1 }
  0x83   : > { %p1896_p10 = pnand %p1895_p9, %p1889_p5 }
 0x13d   : > { %v2178_v16 = vpop.f32.mrf.mxu0 }
 0x13e   : > { %v527_v17 = vadd.f32 %v1515_v14, %v2178_v16  ;;  %v666_v14 = vadd.s32 4294967288, %v661_v10 }
 0x13f   : > { %v2181_v18 = vpop.f32.mrf.mxu0 }
 0x140   : > { %v559_v19 = vrot.slane %v527_v17, %v558_v15 }
 0x141   : > { %v517_v21 = vpop.f32.mrf.mxu0 }
 0x142   : > { %v560_v22 = vcombine.high %v559_v19, %v559_v19  ;;  %v567_v23 = vrot.slane %v559_v19, %v558_v15  ;;  %v2203_v19 = vsub.s32 %v666_v14, %v2172_v13 }
 0x143   : > { %v518_v24 = vpop.f32.mrf.mxu0 }
 0x144   : > { %v580_v27 = vrot.slane %v567_v23, %v2184_v20  ;;  %v574_v28 = vrot.slane %v560_v22, %v558_v15  ;;  %v575_v29 = vcombine.high %v567_v23, %v567_v23  ;;  %v2206_v22 = vsub.s32 %v661_v10, %v2172_v13 }
 0x146   : > { %v597_v32 = vadd.f32 %v580_v27, %v544_v25  ;;  %v584_v33 = vrot.slane %v574_v28, %v2184_v20  ;;  %v598_v34 = vadd.f32 %v580_v27, %v545_v26  ;;  %v588_v36 = vrot.slane %v575_v29, %v2184_v20 }
 0x147   : > { %v576_v39 = vcombine.high %v574_v28, %v574_v28 }
 0x148   : > { %v605_v40 = vmax.f32 %v597_v32, 0.0  ;;  %v599_v41 = vadd.f32 %v584_v33, %v546_v30  ;;  %v606_v42 = vmax.f32 %v598_v34, 0.0  ;;  %v600_v43 = vadd.f32 %v584_v33, %v547_v31 }
 0x149   : > { %v601_v44 = vadd.f32 %v588_v36, %v548_v35  ;;  %v592_v46 = vrot.slane %v576_v39, %v2184_v20  ;;  %v602_v50 = vadd.f32 %v588_v36, %v549_v38 }
 0x14a   : > { %v620_v47 = vmul.f32 %v1518_v37, %v605_v40  ;;  %v607_v48 = vmax.f32 %v599_v41, 0.0  ;;  %v608_v49 = vmax.f32 %v600_v43, 0.0  ;;  %v621_v51 = vmul.f32 %v1518_v37, %v606_v42 }
 0x14b   : > { %v609_v55 = vmax.f32 %v601_v44, 0.0  ;;  %v603_v56 = vadd.f32 %v592_v46, %v550_v45  ;;  %v610_v59 = vmax.f32 %v602_v50, 0.0  ;;  %v604_v60 = vadd.f32 %v592_v46, %v551_v52 }
 0x14c   : > { %v628_v53 = vsel %vm475_vm1, %v620_v47, 0.0  ;;  %v622_v54 = vmul.f32 %v1518_v37, %v607_v48  ;;  %v623_v58 = vmul.f32 %v1518_v37, %v608_v49  ;;  %v631_v61 = vsel %vm475_vm1, %v621_v51, 0.0 }
 0x14d   : > { %629 = vadd.xlane.f32.xlu0 %v628_v53  ;;  %v624_v62 = vmul.f32 %v1518_v37, %v609_v55  ;;  %v611_v63 = vmax.f32 %v603_v56, 0.0  ;;  %v625_v1 = vmul.f32 %v1518_v37, %v610_v59  ;;  %v612_v2 = vmax.f32 %v604_v60, 0.0 }
 0x14e   : > { %v634_v57 = vsel %vm475_vm1, %v622_v54, 0.0  ;;  %v637_v0 = vsel %vm475_vm1, %v623_v58, 0.0  ;;  %v718_v41 = vsub.s32 1, %v2172_v13  ;;  %v722_v45 = vsub.s32 2, %v2172_v13 }
 0x14f   : > { %635 = vadd.xlane.f32.xlu1 %v634_v57  ;;  %v640_v3 = vsel %vm475_vm1, %v624_v62, 0.0  ;;  %v626_v4 = vmul.f32 %v1518_v37, %v611_v63  ;;  %v643_v5 = vsel %vm475_vm1, %v625_v1, 0.0  ;;  %v627_v6 = vmul.f32 %v1518_v37, %v612_v2 }
 0x150   : > { %v726_v54 = vsub.s32 3, %v2172_v13 }
 0x151   : > { %632 = vadd.xlane.f32.xlu0 %v631_v61  ;;  %v646_v7 = vsel %vm475_vm1, %v626_v4, 0.0  ;;  %v649_v8 = vsel %vm475_vm1, %v627_v6, 0.0 }
 0x153   : > { %638 = vadd.xlane.f32.xlu1 %v637_v0 }
 0x155   : > { %641 = vadd.xlane.f32.xlu0 %v640_v3 }
 0x157   : > { %644 = vadd.xlane.f32.xlu1 %v643_v5 }
 0x159   : > { %647 = vadd.xlane.f32.xlu0 %v646_v7 }
 0x15b   : > { %650 = vadd.xlane.f32.xlu1 %v649_v8 }
 0x1d6   : > { %v630_v9 = vpop.xlane.xlu0 %629 }
 0x1d7   : > { %v665_v29 = vrot.slane %v630_v9, %v2206_v22 }
 0x1d8   : > { %v636_v12 = vpop.xlane.xlu1 %635 }
 0x1d9   : > { %v676_v25 = vrot.slane %v636_v12, %v2206_v22 }
 0x1da   : > { %v633_v15 = vpop.xlane.xlu0 %632 }
 0x1db   : > { %v670_v26 = vrot.slane %v633_v15, %v2203_v19 }
 0x1dc   : > { %v639_v17 = vpop.xlane.xlu1 %638 }
 0x1dd   : > { %v680_v23 = vrot.slane %v639_v17, %v2203_v19  ;;  %v672_v33 = vsel %vm671_vm2, %v670_v26, %v665_v29 }
 0x1de   : > { %v642_v21 = vpop.xlane.xlu0 %641 }
 0x1df   : > { %v685_v27 = vrot.slane %v642_v21, %v2206_v22  ;;  %v681_v30 = vsel %vm671_vm2, %v680_v23, %v676_v25 }
 0x1e0   : > { %v645_v24 = vpop.xlane.xlu1 %644  ;;  %v701_v36 = vsel %vm700_vm3, %v681_v30, %v672_v33 }
 0x1e1   : > { %v689_v11 = vrot.slane %v645_v24, %v2203_v19 }
 0x1e2   : > { %v648_v28 = vpop.xlane.xlu0 %647 }
 0x1e3   : > { %v690_v32 = vsel %vm671_vm2, %v689_v11, %v685_v27  ;;  %v694_v34 = vrot.slane %v648_v28, %v2206_v22 }
 0x1e4   : > { %v651_v31 = vpop.xlane.xlu1 %650  ;;  %v703_v38 = vsel %vm702_vm4, %v690_v32, %v701_v36 }
 0x1e5   : > { %v698_v35 = vrot.slane %v651_v31, %v2203_v19 }
 0x1e7   : > { %v699_v37 = vsel %vm671_vm2, %v698_v35, %v694_v34 }
 0x1e8   : > { %v705_v39 = vsel %vm704_vm5, %v699_v37, %v703_v38 }
 0x1e9   : > { %v708_v40 = vsel %vm707_vm6, %v705_v39, -inf  ;;  %v1516_v39 = vld [vmem:[%s2414_s7] ss:$0 sm:$0xff] }
 0x1ea   : > { %709 = vmax.xlane.f32.xlu0 %v708_v40 }
 0x273   : > { %v710_v42 = vpop.xlane.xlu0 %709 }
 0x274   : > { %v715_v43 = vrot.slane %v710_v42, %v2184_v20  ;;  %v719_v44 = vrot.slane %v710_v42, %v718_v41  ;;  %v723_v51 = vrot.slane %v710_v42, %v722_v45  ;;  %v727_v57 = vrot.slane %v710_v42, %v726_v54 }
 0x276   : > { %v732_v46 = vsub.f32 %v630_v9, %v715_v43  ;;  %v733_v47 = vsub.f32 %v633_v15, %v715_v43  ;;  %v734_v48 = vsub.f32 %v636_v12, %v719_v44  ;;  %v735_v52 = vsub.f32 %v639_v17, %v719_v44 }
 0x277   : > { %v736_v55 = vsub.f32 %v642_v21, %v723_v51  ;;  %v737_v58 = vsub.f32 %v645_v24, %v723_v51  ;;  %v738_v60 = vsub.f32 %v648_v28, %v727_v57  ;;  %v739_v0 = vsub.f32 %v651_v31, %v727_v57 }
 0x278   : > { %v740_v49 = vmul.f32 1.442695, %v732_v46  ;;  %v742_v50 = vmul.f32 1.442695, %v733_v47  ;;  %v744_v53 = vmul.f32 1.442695, %v734_v48 }
 0x279   : > { %v746_v56 = vmul.f32 1.442695, %v735_v52  ;;  %v748_v59 = vmul.f32 1.442695, %v736_v55  ;;  %v750_v61 = vmul.f32 1.442695, %v737_v58 }
 0x27a   : > { %1700 = vpow2.f32 %v740_v49  ;;  %v752_v1 = vmul.f32 1.442695, %v738_v60  ;;  %v754_v3 = vmul.f32 1.442695, %v739_v0  ;;  %v1692_v55 = vld [vmem:[#allocation4] sm:$0xff]  }
 0x27b   : > { %1702 = vpow2.f32 %v742_v50 }
 0x27c   : > { %1704 = vpow2.f32 %v744_v53 }
 0x27d   : > { %1706 = vpow2.f32 %v746_v56  ;;  %v1979_v56 = vmov 0.0  }
 0x27e   : > { %1708 = vpow2.f32 %v748_v59  ;;  %1553 = vmatprep.subr.bf16.mxu1 %v1979_v56  ;;  %1555 = vmatprep.mubr.msk.bf16.mxu1 %vm1980_vm7, %v1979_v56 }
 0x27f   : > { %1710 = vpow2.f32 %v750_v61  ;;  %1554 = vmatpush3.bf16.msra.mxu1 %v1692_v55  ;;  %1577 = vmatprep.subr.bf16.mxu0 %v1979_v56 }
 0x280   : > { %1712 = vpow2.f32 %v752_v1  ;;  %1559 = vmatprep.subr.bf16.mxu1 %v1979_v56  ;;  %1585 = vmatprep.mubr.msk.bf16.mxu0 %vm1980_vm7, %v1979_v56 }
 0x281   : > { %1714 = vpow2.f32 %v754_v3 }
 0x287   : > { %v1701_v62 = vpop.eup %1700 }
 0x288   : > { %v1703_v63 = vpop.eup %1702  ;;  %765 = vperm.xlu1 %1684, %v1701_v62  }
 0x289   : > { %768 = vperm.xlu0 %1685, %v1703_v63   ;;  %v1705_v2 = vpop.eup %1704 }
 0x28a   : > { %v1707_v4 = vpop.eup %1706 }
 0x28b   : > { %v1709_v5 = vpop.eup %1708 }
 0x28c   : > { %771 = vperm.xlu1 %1684, %v1705_v2   ;;  %v1711_v6 = vpop.eup %1710 }
 0x28d   : > { %v2234_v7 = vpop.eup %1712 }
 0x28e   : > { %v2237_v8 = vpop.eup %1714 }
 0x290   : > { %774 = vperm.xlu1 %1684, %v1707_v4  }
 0x294   : > { %777 = vperm.xlu1 %1684, %v1709_v5  }
 0x298   : > { %780 = vperm.xlu1 %1684, %v1711_v6  }
 0x29c   : > { %783 = vperm.xlu1 %1684, %v2234_v7  }
 0x2a0   : > { %786 = vperm.xlu1 %1684, %v2237_v8  }
 0x303   : > { %v766_v9 = vpop.permute.xlu1 %765 }
 0x304   : > { %v769_v17 = vpop.permute.xlu0 %768  ;;  %v791_v26 = vrot.slane %v766_v9, %v2206_v22 }
 0x305   : > { %v795_v25 = vrot.slane %v769_v17, %v2203_v19  ;;  %v1694_v17 = vld [vmem:[#allocation4 + $0x10] sm:$0xff]  }
 0x307   : > { %v772_v10 = vpop.permute.xlu1 %771  ;;  %v796_v31 = vsel %vm671_vm2, %v795_v25, %v791_v26 }
 0x308   : > { %v800_v11 = vrot.slane %v772_v10, %v2206_v22 }
 0x30b   : > { %v775_v12 = vpop.permute.xlu1 %774 }
 0x30c   : > { %v804_v21 = vrot.slane %v775_v12, %v2203_v19 }
 0x30e   : > { %v805_v28 = vsel %vm671_vm2, %v804_v21, %v800_v11 }
 0x30f   : > { %v778_v14 = vpop.permute.xlu1 %777  ;;  %v824_v34 = vsel %vm700_vm3, %v805_v28, %v796_v31 }
 0x310   : > { %v809_v27 = vrot.slane %v778_v14, %v2206_v22 }
 0x313   : > { %v781_v15 = vpop.permute.xlu1 %780 }
 0x314   : > { %v813_v23 = vrot.slane %v781_v15, %v2203_v19 }
 0x316   : > { %v814_v29 = vsel %vm671_vm2, %v813_v23, %v809_v27  ;;  %v1695_v27 = vld [vmem:[#allocation4 + $0x18] sm:$0xff]  }
 0x317   : > { %v784_v24 = vpop.permute.xlu1 %783  ;;  %v825_v36 = vsel %vm702_vm4, %v814_v29, %v824_v34 }
 0x318   : > { %v818_v32 = vrot.slane %v784_v24, %v2206_v22 }
 0x31b   : > { %v787_v30 = vpop.permute.xlu1 %786 }
 0x31c   : > { %v822_v33 = vrot.slane %v787_v30, %v2203_v19 }
 0x31e   : > { %v823_v35 = vsel %vm671_vm2, %v822_v33, %v818_v32 }
 0x31f   : > { %v826_v37 = vsel %vm704_vm5, %v823_v35, %v825_v36 }
 0x320   : > { %v828_v38 = vsel %vm707_vm6, %v826_v37, 0.0 }
 0x321   : > { %829 = vadd.xlane.f32.xlu1 %v828_v38 }
 0x332   : > { %534 = vrot.lane.b32.xlu1 %v1516_v39, %s1978_s26 }
 0x3aa   : > { %v830_v40 = vpop.xlane.xlu1 %829 }
 0x3ab   : > { %1716 = vrcp.f32 %v830_v40 }
 0x3b8   : > { %v1717_v42 = vpop.eup %1716 }
 0x3b9   : > { %v836_v43 = vrot.slane %v1717_v42, %v2184_v20  ;;  %v840_v47 = vrot.slane %v1717_v42, %v718_v41  ;;  %v844_v53 = vrot.slane %v1717_v42, %v722_v45  ;;  %v848_v60 = vrot.slane %v1717_v42, %v726_v54 }
 0x3bb   : > { %v2261_v44 = vmul.f32 %v1701_v62, %v836_v43  ;;  %v2263_v46 = vmul.f32 %v1703_v63, %v836_v43  ;;  %v2269_v50 = vmul.f32 %v1705_v2, %v840_v47  ;;  %v2271_v51 = vmul.f32 %v1707_v4, %v840_v47 }
 0x3bc   : > { %v2280_v57 = vmul.f32 %v1709_v5, %v844_v53  ;;  %v2282_v58 = vmul.f32 %v1711_v6, %v844_v53  ;;  %v2293_v62 = vmul.f32 %v2234_v7, %v848_v60  ;;  %v2296_v63 = vmul.f32 %v2237_v8, %v848_v60  ;;  %v1693_v7 = vld [vmem:[#allocation4 + $0x8] sm:$0xff]  }
 0x3bd   : > { %v861_v48 = vpack.c.bf16 %v2263_v46, %v2261_v44  ;;  %v862_v20 = vpack.c.bf16 %v2271_v51, %v2269_v50 }
 0x3be   : > { %v863_v59 = vpack.c.bf16 %v2282_v58, %v2280_v57  ;;  %v864_v1 = vpack.c.bf16 %v2296_v63, %v2293_v62 }
 0x3bf   : > { %v874_v49 = vunpack.c.l.b16 %v861_v48  ;;  %v875_v52 = vunpack.c.h.b16 %v861_v48  ;;  %v943_v41 = vunpack.c.l.b16 %v862_v20  ;;  %v944_v45 = vunpack.c.h.b16 %v862_v20 }
 0x3c0   : > { %v1011_v61 = vunpack.c.l.b16 %v863_v59  ;;  %v1012_v0 = vunpack.c.h.b16 %v863_v59  ;;  %v1079_v2 = vunpack.c.l.b16 %v864_v1  ;;  %v1080_v3 = vunpack.c.h.b16 %v864_v1 }
 0x3c1   : > { %877 = vperm.xlu0 %1685, %v874_v49  }
 0x3c5   : > { %880 = vperm.xlu0 %1685, %v875_v52  }
 0x3c9   : > { %946 = vperm.xlu0 %1685, %v943_v41  }
 0x3cd   : > { %949 = vperm.xlu0 %1685, %v944_v45  }
 0x3d1   : > { %1014 = vperm.xlu0 %1685, %v1011_v61  }
 0x3d5   : > { %1017 = vperm.xlu0 %1685, %v1012_v0   ;;  %v1696_v0 = vld [vmem:[#allocation13 + $0x18] sm:$0xff]  }
 0x3d6   : > { %1578 = vmatpush3.bf16.msra.mxu0 %v1696_v0 }
 0x3d7   : > { %1579 = vmatprep.subr.bf16.mxu0 %v1979_v56 }
 0x3d9   : > { %1082 = vperm.xlu0 %1685, %v1079_v2   ;;  %v1697_v2 = vld [vmem:[#allocation13 + $0x10] sm:$0xff]  }
 0x3da   : > { %1580 = vmatpush3.bf16.msra.mxu0 %v1697_v2 }
 0x3db   : > { %1581 = vmatprep.subr.bf16.mxu0 %v1979_v56 }
 0x3dd   : > { %1085 = vperm.xlu0 %1685, %v1080_v3  }
 0x43c   : > { %v878_v13 = vpop.permute.xlu0 %877 }
 0x43d   : > { %v885_v4 = vrot.slane %v878_v13, %v2206_v22  ;;  %v1698_v13 = vld [vmem:[#allocation13 + $0x8] sm:$0xff]  }
 0x43e   : > { %1582 = vmatpush3.bf16.msra.mxu0 %v1698_v13 }
 0x43f   : > { %1583 = vmatprep.subr.bf16.mxu0 %v1979_v56 }
 0x440   : > { %v881_v54 = vpop.permute.xlu0 %880 }
 0x441   : > { %v889_v5 = vrot.slane %v881_v54, %v2203_v19  ;;  %v1699_v54 = vld [vmem:[#allocation13] sm:$0xff]  }
 0x442   : > { %1584 = vmatpush3.bf16.msra.mxu0 %v1699_v54 }
 0x443   : > { %v890_v6 = vsel %vm671_vm2, %v889_v5, %v885_v4  ;;  %v535_v4 = vpop.permute.xlu1 %534 }
 0x444   : > { %v891_v8 = vpack.c.b16 %v890_v6, %v890_v6  ;;  %v947_v9 = vpop.permute.xlu0 %946  ;;  %v537_v5 = vadd.f32 %v535_v4, %v2178_v16 }
 0x445   : > { %v954_v12 = vrot.slane %v947_v9, %v2206_v22 }
 0x446   : > { %1556 = vmatmul.mubr.msk.bf16.vlgmr.msra.gmra.mxu1 %vm898_vm8, %v891_v8  ;;  %v1517_v6 = vmul.f32 -1.442695, %v537_v5 }
 0x447   : > { %1560 = vmatpush3.bf16.msra.mxu1 %v1693_v7  ;;  %1561 = vmatprep.mubr.msk.bf16.mxu1 %vm1980_vm7, %v1979_v56 }
 0x448   : > { %v950_v10 = vpop.permute.xlu0 %949  ;;  %1565 = vmatprep.subr.bf16.mxu1 %v1979_v56  ;;  %1718 = vpow2.f32 %v1517_v6 }
 0x449   : > { %v958_v14 = vrot.slane %v950_v10, %v2203_v19 }
 0x44b   : > { %v959_v15 = vsel %vm671_vm2, %v958_v14, %v954_v12 }
 0x44c   : > { %v960_v21 = vpack.c.b16 %v959_v15, %v959_v15  ;;  %v1015_v23 = vpop.permute.xlu0 %1014 }
 0x44d   : > { %v1022_v25 = vrot.slane %v1015_v23, %v2206_v22 }
 0x44e   : > { %1562 = vmatmul.mubr.msk.bf16.vlgmr.msra.gmra.mxu1 %vm898_vm8, %v960_v21 }
 0x44f   : > { %1566 = vmatpush3.bf16.msra.mxu1 %v1694_v17  ;;  %1567 = vmatprep.mubr.msk.bf16.mxu1 %vm1980_vm7, %v1979_v56 }
 0x450   : > { %v1018_v24 = vpop.permute.xlu0 %1017  ;;  %1571 = vmatprep.subr.bf16.mxu1 %v1979_v56 }
 0x451   : > { %v1026_v26 = vrot.slane %v1018_v24, %v2203_v19  ;;  %v1162_v24 = vld [vmem:[%s1161_s28] sm:$0xf] }
 0x453   : > { %v1027_v11 = vsel %vm671_vm2, %v1026_v26, %v1022_v25 }
 0x454   : > { %v1028_v28 = vpack.c.b16 %v1027_v11, %v1027_v11  ;;  %v1083_v29 = vpop.permute.xlu0 %1082 }
 0x455   : > { %v1090_v31 = vrot.slane %v1083_v29, %v2206_v22  ;;  %v1719_v7 = vpop.eup %1718 }
 0x456   : > { %1568 = vmatmul.mubr.msk.bf16.vlgmr.msra.gmra.mxu1 %vm898_vm8, %v1028_v28  ;;  %v541_v8 = vadd.f32 1.0, %v1719_v7 }
 0x457   : > { %1572 = vmatpush3.bf16.msra.mxu1 %v1695_v27  ;;  %1573 = vmatprep.mubr.msk.bf16.mxu1 %vm1980_vm7, %v1979_v56  ;;  %v449_v56 = vld [vmem:[#allocation3] sm:$0xf] }
 0x458   : > { %v1086_v30 = vpop.permute.xlu0 %1085  ;;  %1720 = vrcp.f32 %v541_v8 }
 0x459   : > { %v1094_v32 = vrot.slane %v1086_v30, %v2203_v19 }
 0x45b   : > { %v1095_v33 = vsel %vm671_vm2, %v1094_v32, %v1090_v31 }
 0x45c   : > { %v1096_v34 = vpack.c.b16 %v1095_v33, %v1095_v33 }
 0x45e   : > { %1574 = vmatmul.mubr.msk.bf16.vlgmr.msra.gmra.mxu1 %vm898_vm8, %v1096_v34 }
 0x465   : > { %v1721_v9 = vpop.eup %1720 }
 0x506   : > { %v936_v35 = vpop.f32.mrf.mxu1 }
 0x508   : > { %v1557_v36 = vpop.f32.mrf.mxu1 }
 0x50a   : > { %v939_v37 = vpop.f32.mrf.mxu1 }
 0x50c   : > { %v1558_v38 = vpop.f32.mrf.mxu1 }
 0x50e   : > { %v1004_v39 = vpop.f32.mrf.mxu1 }
 0x50f   : > { %v1150_v52 = vrot.slane %v1004_v39, 7 }
 0x510   : > { %v1563_v40 = vpop.f32.mrf.mxu1 }
 0x511   : > { %v1151_v41 = vsel %vm700_vm3, %v1150_v52, %v936_v35 }
 0x512   : > { %v1007_v42 = vpop.f32.mrf.mxu1 }
 0x514   : > { %v1564_v43 = vpop.f32.mrf.mxu1 }
 0x516   : > { %v1072_v47 = vpop.f32.mrf.mxu1 }
 0x517   : > { %v1152_v20 = vrot.slane %v1072_v47, 6 }
 0x518   : > { %v1569_v48 = vpop.f32.mrf.mxu1 }
 0x519   : > { %v1153_v60 = vsel %vm702_vm4, %v1152_v20, %v1151_v41 }
 0x51a   : > { %v1075_v49 = vpop.f32.mrf.mxu1 }
 0x51c   : > { %v1570_v53 = vpop.f32.mrf.mxu1 }
 0x51e   : > { %v1140_v55 = vpop.f32.mrf.mxu1 }
 0x51f   : > { %v1154_v45 = vrot.slane %v1140_v55, 5 }
 0x520   : > { %v1575_v59 = vpop.f32.mrf.mxu1 }
 0x521   : > { %v1155_v61 = vsel %vm704_vm5, %v1154_v45, %v1153_v60 }
 0x522   : > { %1156 = vrot.lane.b32.xlu0 %v1155_v61, %s1978_s26  ;;  %v1143_v1 = vpop.f32.mrf.mxu1 }
 0x524   : > { %v1576_v3 = vpop.f32.mrf.mxu1 }
 0x594   : > { %v1157_v10 = vpop.permute.xlu0 %1156 }
 0x595   : > { %v1159_v12 = vmul.f32 %v1721_v9, %v1157_v10 }
 0x597   : > { %v1172_v14 = vpack.c.bf16 %v1159_v12, %v1159_v12 }
 0x599   : > { %1182 = vrot.lane.b32.xlu0 %v1172_v14, %s1981_s23 }
 0x59d   : > { %1165 = vrot.lane.b32.xlu0 %v2178_v16, %s1978_s26 }
 0x5a1   : > { %1167 = vrot.lane.b32.xlu0 %v2181_v18, %s1978_s26 }
 0x5a5   : > { %1261 = vrot.lane.b32.xlu0 %v449_v56, %s1978_s26 }
 0x60b   : > { %v1183_v15 = vpop.permute.xlu0 %1182 }
 0x60c   : > { %1586 = vmatmul.mubr.msk.bf16.vlgmr.msra.gmra.mxu0 %vm1208_vm9, %v1183_v15 }
 0x60f   : > { %v1166_v17 = vpop.permute.xlu0 %1165 }
 0x613   : > { %v1168_v21 = vpop.permute.xlu0 %1167 }
 0x614   : > { %v1169_v23 = vsel %vm475_vm1, %v1166_v17, %v1168_v21 }
 0x615   : > { %v1171_v25 = vadd.f32 %v1169_v23, %v1162_v24 }
 0x617   : > { %v1262_v35 = vpop.permute.xlu0 %1261 }
 0x6cc   : > { %v1246_v16 = vpop.f32.mrf.mxu0 }
 0x6cd   : > { %v1252_v26 = vadd.f32 %v1246_v16, %v1171_v25 }
 0x6ce   : > { %v1587_v11 = vpop.f32.mrf.mxu0 }
 0x6cf   : > { %1722 = vtanh.f32 %v1252_v26  ;;  %v1533_v29 = vmul.f32 -1.442695, %v1252_v26 }
 0x6d0   : > { %v1249_v18 = vpop.f32.mrf.mxu0 }
 0x6d1   : > { %1724 = vpow2.f32 %v1533_v29 }
 0x6d2   : > { %v1588_v27 = vpop.f32.mrf.mxu0 }
 0x6dc   : > { %v1723_v28 = vpop.eup %1722 }
 0x6dd   : > { %1266 = vrot.lane.b32.xlu1 %v1723_v28, %s1982_s24 }
 0x6de   : > { %v1725_v30 = vpop.eup %1724 }
 0x6df   : > { %v1256_v31 = vadd.f32 1.0, %v1725_v30 }
 0x6e1   : > { %1726 = vrcp.f32 %v1256_v31 }
 0x6ee   : > { %v1727_v32 = vpop.eup %1726 }
 0x6ef   : > { %v1264_v36 = vmul.f32 %v1727_v32, %v1262_v35 }
 0x74f   : > { %v1267_v33 = vpop.permute.xlu1 %1266 }
 0x750   : > { %v1269_v34 = vmul.f32 %v1727_v32, %v1267_v33 }
 0x752   : > { %1271 = vrot.lane.b32.xlu1 %v1269_v34, %s1978_s26 }
 0x756   : > { %1303 = vperm.xlu1 %1684, %v2261_v44  }
 0x75a   : > { %1309 = vperm.xlu1 %1684, %v2269_v50  }
 0x75e   : > { %1315 = vperm.xlu1 %1684, %v2280_v57  }
 0x762   : > { %1321 = vperm.xlu1 %1684, %v2293_v62  }
 0x7c4   : > { %v1272_v37 = vpop.permute.xlu1 %1271 }
 0x7c5   : > { %v1274_v38 = vadd.f32 %v1272_v37, %v1264_v36 }
 0x7c7   : > { %1728 = vtanh.f32 %v1274_v38 }
 0x7d1   : > { %v1304_v57 = vpop.permute.xlu1 %1303 }
 0x7d2   : > { %v1329_v52 = vrot.slane %v1304_v57, %v2206_v22 }
 0x7d4   : > { %v1729_v39 = vpop.eup %1728 }
 0x7d5   : > { %1277 = vrot.lane.b32.xlu0 %v1729_v39, %s1982_s24  ;;  %v1310_v62 = vpop.permute.xlu1 %1309 }
 0x7d9   : > { %1306 = vperm.xlu0 %1685, %v2263_v46   ;;  %v1316_v42 = vpop.permute.xlu1 %1315 }
 0x7da   : > { %v1347_v48 = vrot.slane %v1316_v42, %v2206_v22 }
 0x7dd   : > { %1312 = vperm.xlu0 %1685, %v2271_v51   ;;  %v1338_v51 = vrot.slane %v1310_v62, %v2206_v22  ;;  %v1322_v49 = vpop.permute.xlu1 %1321 }
 0x7de   : > { %v1356_v41 = vrot.slane %v1322_v49, %v2206_v22 }
 0x7e1   : > { %1318 = vperm.xlu0 %1685, %v2282_v58  }
 0x7e5   : > { %1324 = vperm.xlu0 %1685, %v2296_v63  }
 0x7e9   : > { %1288 = vrot.lane.b32.xlu0 %v1274_v38, %s1981_s23 }
 0x847   : > { %v1278_v44 = vpop.permute.xlu0 %1277 }
 0x848   : > { %v1280_v50 = vmul.f32 %v1727_v32, %v1278_v44 }
 0x84a   : > { %1282 = vrot.lane.b32.xlu1 %v1280_v50, %s1978_s26 }
 0x854   : > { %v1307_v40 = vpop.permute.xlu0 %1306 }
 0x855   : > { %v1333_v58 = vrot.slane %v1307_v40, %v2203_v19 }
 0x857   : > { %v1334_v45 = vsel %vm671_vm2, %v1333_v58, %v1329_v52 }
 0x858   : > { %v1313_v43 = vpop.permute.xlu0 %1312 }
 0x859   : > { %v1342_v47 = vrot.slane %v1313_v43, %v2203_v19 }
 0x85b   : > { %v1343_v20 = vsel %vm671_vm2, %v1342_v47, %v1338_v51 }
 0x85c   : > { %v1319_v46 = vpop.permute.xlu0 %1318  ;;  %v1362_v60 = vsel %vm700_vm3, %v1343_v20, %v1334_v45 }
 0x85d   : > { %v1351_v63 = vrot.slane %v1319_v46, %v2203_v19 }
 0x85f   : > { %v1352_v53 = vsel %vm671_vm2, %v1351_v63, %v1347_v48 }
 0x860   : > { %v1325_v55 = vpop.permute.xlu0 %1324  ;;  %v1363_v61 = vsel %vm702_vm4, %v1352_v53, %v1362_v60 }
 0x861   : > { %v1360_v59 = vrot.slane %v1325_v55, %v2203_v19 }
 0x863   : > { %v1361_v0 = vsel %vm671_vm2, %v1360_v59, %v1356_v41 }
 0x864   : > { %v1364_v1 = vsel %vm704_vm5, %v1361_v0, %v1363_v61  ;;  %v1289_v2 = vpop.permute.xlu0 %1288 }
 0x865   : > { %1291 = vst.msk [vmem:[#allocation3] sm:$0xf] %vm1285_vm10, %v1289_v2 }
 0x866   : > { %1367 = vst.msk [vmem:[%s1366_s18] sm:$0xf] %vm707_vm6, %v1364_v1 }
 0x867   : > { %1899 = shalt.err (!%p1896_p10)
}
 0x868   : > { %s1984_s21 = smov 4   ;;  %s1985_s30 = smov [#allocation15]  }
 0x869   : > { %1616 = dma.vmem_to_hbm [thread:$0]  (%p1652_p2), %s1388_s13, 448, %s2418_s11, [#allocation17], %s1982_s24, %s1982_s24, %s1984_s21  }
 0x86a   : > { %s1374_s15 = sshll.u32 %s1985_s30, 4  ;;  %s1292_s16 = scalar_lea.vmem [#allocation15], %s2339_s25  ;;  %s1375_s15 = int_to_ptr.vmem [resolvable:$true] %s1374_s15 }
 0x86b   : > { %s1910_s14 = scalar_lea.vmem %s1375_s15, 448  ;;  %p1917_p13 = scmp.lt.s32.totalorder %s1375_s15, %s1375_s15 }
 0x86c   : > { %p1911_p11 = scmp.ne.s32.totalorder %s1375_s15, %s1910_s14  ;;  %p1918_p0 = scmp.lt.s32.totalorder %s1910_s14, %s1910_s14 }
 0x86e   : > { %p1912_p12 = pnand %p1911_p11, %p1652_p2  ;;  %p1919_p3 = por %p1918_p0, %p1917_p13 }
 0x870   : > { %p1913_p6 = pneg %p1912_p12 }
 0x872   : > { %p1920_p4 = pnand %p1919_p3, %p1913_p6 }
 0x8bc   : > { %v1283_v19 = vpop.permute.xlu1 %1282 }
 0x8bd   : > { %1286 = vst.msk [vmem:[#allocation2] sm:$0xf] %vm1285_vm10, %v1283_v19  ;;  %1293 = vst.msk [vmem:[%s1292_s16] sm:$0xf] %vm1285_vm10, %v1283_v19 }
 0x8be   : > { %1923 = shalt.err (!%p1920_p4)
}
 0x8bf   : > { %1614 = dma.vmem_to_hbm [thread:$0]  (%p1652_p2), %s1375_s15, 448, %s2417_s10, [#allocation6], %s1982_s24, %s1982_s24, %s1984_s21  }
 0x8c0   : > { %1955 = dma.done.wait (%p1652_p2), [#allocation6], 448  }
 0x8c1   : > { %1957 = vsyncadd (%p1652_p2), [#allocation6], 4294966848 }
 0x8c2   : > { %1959 = dma.done.wait (%p1652_p2), [#allocation17], 448  }
 0x8c3   : > { %1961 = vsyncadd (%p1652_p2), [#allocation17], 4294966848 }
 0x8c4 PF: > { %s28_s17 = sadd.s32 1, %s1964_s17  }
 0x8c5   : > { %p25_p1 = scmp.ge.s32.totalorder %s28_s17, 9  }
 0x8c7   :  { %27 = sbr.rel (!%p25_p1) target bundleno = 6 (0x6), region = 124 }
 0x8cc   :  { %1407 = vsyncpa [#allocation5], 1 }
 0x8cd   :  { %1409 = vsyncpa [#allocation5 + $0x1], 1 }
 0x8ce   :  { %1410 = vsyncpa [#allocation8], 1 }
 0x8cf   :  { %1411 = vsyncpa [#allocation11], 1 }
 0x8d0   :  { %1412 = vsyncpa [#allocation14], 1 }
 0x8d1   :  { %1413 = vsyncpa [#allocation6], 1 }
 0x8d2   :  { %1415 = vsyncpa [#allocation6 + $0x1], 1 }
 0x8d3   :  { %1416 = vsyncpa [#allocation17], 1 }

</bundles_post_ra>
